<compile_context>
chip_gen: v5e
topology: v5e:2x2
jax: 0.10.0
libtpu: 0.0.40
codegen_flags: <defaults>
</compile_context>

<pallas_src>
import functools
import math

import jax
import jax.numpy as jnp
from jax import lax
from jax.experimental import pallas as pl
from jax.experimental.pallas import tpu as pltpu


def _attn_kernel(q_ref, k_ref, v_ref, o_ref, m_sc, l_sc, acc_sc, *,
                 seq_len, kv_tile, need_mask, n_out_ch, exp_dtype):
    kv = pl.program_id(2)

    @pl.when(kv == 0)
    def _init():
        m_sc[...] = jnp.full_like(m_sc, -jnp.inf)
        l_sc[...] = jnp.zeros_like(l_sc)
        acc_sc[...] = jnp.zeros_like(acc_sc)

    q = q_ref[...]            # (bh, ch, tq), pre-scaled by 1/sqrt(ch) in f32
    k = k_ref[...]            # (bh, ch, tk)
    v = v_ref[...]            # (bh, ch+1, tk); last channel is all-ones

    # s[b, t, s'] = sum_c q[b,c,t] * k[b,c,s']   ('bct,bcs->bts')
    s = lax.dot_general(q, k, (((1,), (1,)), ((0,), (0,))),
                        preferred_element_type=jnp.float32)      # (bh,tq,tk) f32

    # Online-softmax statistics, kept lane-dense as (bh, 1, tq).
    m_prev = m_sc[...]                                           # (bh,1,tq)
    s_max = jnp.max(s, axis=-1)[:, None, :]                      # (bh,1,tq)
    m_new = jnp.maximum(m_prev, s_max)
    alpha = jnp.exp(m_prev - m_new)                              # (bh,1,tq) f32

    # One small lane->sublane transpose per step to broadcast m over kv lanes.
    m_bcast = jnp.swapaxes(m_new, 1, 2)                          # (bh,tq,1)
    p = jnp.exp((s - m_bcast).astype(exp_dtype))                 # (bh,tq,tk)

    if need_mask:
        # Zero out padded kv positions.  K is zero-padded, so s == 0 there and
        # the running max stays finite: no -inf / NaN hazards anywhere.
        kv_pos = kv * kv_tile + lax.broadcasted_iota(
            jnp.int32, (1, 1, kv_tile), 2)
        p = jnp.where(kv_pos < seq_len, p, jnp.zeros((), p.dtype))

    p = p.astype(v.dtype)
    # pv[b, c, t] = sum_s v[b,c,s] * p[b,t,s]    ('bcs,bts->bct')
    # The ones channel of v makes pv[:, ch, :] == sum_s p (softmax denominator).
    pv = lax.dot_general(v, p, (((2,), (2,)), ((0,), (0,))),
                         preferred_element_type=jnp.float32)     # (bh,ch+1,tq)

    acc_sc[...] = alpha * acc_sc[...] + pv[:, :n_out_ch, :]
    l_sc[...] = alpha * l_sc[...] + pv[:, n_out_ch:, :]
    m_sc[...] = m_new

    @pl.when(kv == pl.num_programs(2) - 1)
    def _finalize():
        inv_l = pl.reciprocal(l_sc[...], approx=False)           # (bh,1,tq)
        o_ref[...] = (acc_sc[...] * inv_l).astype(o_ref.dtype)


def _round_up(x, m):
    return (x + m - 1) // m * m


def _choose_seq_tiles(length, pref_q, pref_kv, max_pad_ratio=1.3):
    """Pick (tq, tk, padded_len): tiles first, padding second (bounded waste)."""
    l128 = _round_up(length, 128)
    if l128 <= pref_q:
        tq, l_pad = l128, l128                    # whole sequence in one q tile
    else:
        tq, l_pad = 128, l128                     # fallback (loop always hits 128)
        for t in range(max(128, pref_q - pref_q % 128), 127, -128):
            lp = _round_up(length, t)
            if lp <= max_pad_ratio * l128:
                tq, l_pad = t, lp
                break
    # kv tile: largest multiple of 128 <= pref_kv that divides the padded length.
    tk = max(128, min(pref_kv, l_pad))
    tk -= tk % 128
    while l_pad % tk:
        tk -= 128
    return tq, tk, l_pad


def _vmem_budget():
    """(per-step VMEM budget, vmem_limit_bytes) — generation aware."""
    try:
        cap = pltpu.get_tpu_info().vmem_capacity_bytes
    except Exception:
        cap = None
    if cap is not None and cap >= 96 * 1024 * 1024:      # v5e / v6e: 128 MiB VMEM
        return 48 * 1024 * 1024, 64 * 1024 * 1024
    return 30 * 1024 * 1024, 44 * 1024 * 1024            # v7x (64 MiB/TC) / unknown


def _device_kind():
    try:
        return jax.devices()[0].device_kind.lower()
    except Exception:
        return ""


def _pick_head_block(B, ch, ch_v, tq, tk, in_item, out_item, n_q_tiles, budget):
    """Heads per grid step: VMEM-budgeted, keeping >=4 parallel grid steps."""
    ch_q = _round_up(max(ch, 1), 8)        # sublane padding of q/k/out blocks
    ch_vp = _round_up(max(ch_v, 1), 8)     # sublane padding of the v block
    target = min(4, B * n_q_tiles)
    for bh in (8, 4, 2, 1):
        if B % bh:
            continue
        io = (2 * bh * (ch_q * tq + ch_q * tk + ch_vp * tk) * in_item   # q,k,v x2
              + 2 * bh * ch_q * tq * out_item)                          # out   x2
        scratch = bh * (ch_q * tq + 2 * 8 * tq) * 4                     # acc+m+l
        temps = 3 * bh * tq * tk * 4                                    # s/p copies
        if io + scratch + temps <= budget and (B // bh) * n_q_tiles >= target:
            return bh
    return 1


def qkv_attention(qkv, n_heads, *, q_tile=512, kv_tile=512, use_bf16_matmul=True):
    """Pallas equivalent of QKVAttention.forward.

    qkv: (bs, 3 * n_heads * ch, length) -> (bs, n_heads * ch, length)
    """
    bs, width, length = qkv.shape
    assert width % (3 * n_heads) == 0
    ch = width // (3 * n_heads)
    B = bs * n_heads

    q, k, v = jnp.split(qkv, 3, axis=1)
    q = q.reshape(B, ch, length)
    k = k.reshape(B, ch, length)
    v = v.reshape(B, ch, length)

    tq, tk, l_pad = _choose_seq_tiles(length, q_tile, kv_tile)
    need_mask = l_pad != length
    if need_mask:
        pad = ((0, 0), (0, 0), (0, l_pad - length))
        q, k, v = jnp.pad(q, pad), jnp.pad(k, pad), jnp.pad(v, pad)

    compute_dtype = (jnp.bfloat16
                     if (use_bf16_matmul and qkv.dtype == jnp.float32)
                     else qkv.dtype)
    # Single-sided scale (scale**2 == 1/sqrt(sqrt(ch))**2... i.e. 1/sqrt(ch))
    # applied in f32 *before* the bf16 cast; all casts happen once here (fused
    # with pad by XLA), never per kv step inside the kernel.
    q = (q * (1.0 / math.sqrt(ch))).astype(compute_dtype)
    k = k.astype(compute_dtype)
    # Extra all-ones channel: the PV matmul's last output channel becomes the
    # softmax row-sum, so the kernel needs no cross-lane reduction.
    v = jnp.concatenate([v, jnp.ones((B, 1, l_pad), v.dtype)],
                        axis=1).astype(compute_dtype)

    budget, vmem_limit = _vmem_budget()
    n_q_tiles = l_pad // tq
    bh = _pick_head_block(B, ch, ch + 1, tq, tk,
                          jnp.dtype(compute_dtype).itemsize,
                          jnp.dtype(qkv.dtype).itemsize,
                          n_q_tiles, budget)

    use_bf16_exp = (compute_dtype == jnp.bfloat16 and
                    any(t in _device_kind() for t in ("v6", "v7", "7x")))
    exp_dtype = jnp.bfloat16 if use_bf16_exp else jnp.float32

    kernel = functools.partial(
        _attn_kernel, seq_len=length, kv_tile=tk, need_mask=need_mask,
        n_out_ch=ch, exp_dtype=exp_dtype)

    grid = (B // bh, l_pad // tq, l_pad // tk)
    q_spec = pl.BlockSpec((bh, ch, tq), lambda b, t, s: (b, 0, t))
    k_spec = pl.BlockSpec((bh, ch, tk), lambda b, t, s: (b, 0, s))
    v_spec = pl.BlockSpec((bh, ch + 1, tk), lambda b, t, s: (b, 0, s))
    o_spec = pl.BlockSpec((bh, ch, tq), lambda b, t, s: (b, 0, t))
    # Note: pl.Buffered(3) on k_spec/v_spec is a possible v5e DMA-hiding sweep;
    # left at the default double buffering here (needs on-HW measurement).

    out = pl.pallas_call(
        kernel,
        out_shape=jax.ShapeDtypeStruct((B, ch, l_pad), qkv.dtype),
        grid_spec=pltpu.PrefetchScalarGridSpec(
            num_scalar_prefetch=0,
            grid=grid,
            in_specs=[q_spec, k_spec, v_spec],
            out_specs=o_spec,
            scratch_shapes=[
                pltpu.VMEM((bh, 1, tq), jnp.float32),     # running max m
                pltpu.VMEM((bh, 1, tq), jnp.float32),     # running denom l
                pltpu.VMEM((bh, ch, tq), jnp.float32),    # running numerator
            ],
        ),
        compiler_params=pltpu.CompilerParams(
            dimension_semantics=("parallel", "parallel", "arbitrary"),
            vmem_limit_bytes=vmem_limit,
        ),
    )(q, k, v)

    if need_mask:
        out = out[:, :, :length]
    return out.reshape(bs, n_heads * ch, length)


def _reference(qkv, n_heads):
    """Pure-JAX reference mirroring the PyTorch forward exactly."""
    bs, width, length = qkv.shape
    ch = width // (3 * n_heads)
    q, k, v = jnp.split(qkv, 3, axis=1)
    scale = 1.0 / math.sqrt(math.sqrt(ch))
    qh = (q * scale).reshape(bs * n_heads, ch, length)
    kh = (k * scale).reshape(bs * n_heads, ch, length)
    vh = v.reshape(bs * n_heads, ch, length)
    w = jnp.einsum("bct,bcs->bts", qh, kh)
    w = jax.nn.softmax(w.astype(jnp.float32), axis=-1).astype(w.dtype)
    a = jnp.einsum("bts,bcs->bct", w, vh)
    return a.reshape(bs, -1, length)


def _check(bs, n_heads, ch, length, key, tol, **kw):
    width = 3 * n_heads * ch
    qkv = jax.random.normal(key, (bs, width, length), dtype=jnp.float32)
    out = jax.block_until_ready(qkv_attention(qkv, n_heads, **kw))
    ref = _reference(qkv, n_heads)
    assert out.shape == (bs, n_heads * ch, length), out.shape
    err = float(jnp.max(jnp.abs(out - ref)))
    assert err < tol, (bs, n_heads, ch, length, err)


if __name__ == "__main__":
    key = jax.random.PRNGKey(0)
    k0, k1, k2, k3 = jax.random.split(key, 4)

    # Default bf16-operand path, short padded/masked sequence.
    _check(2, 2, 8, 16, k0, 1e-1)
    # Exact f32 path, awkward length (multi-tile tiles + tail mask + online softmax).
    _check(1, 2, 16, 640, k1, 5e-3, use_bf16_matmul=False)
    # Default bf16 path on the same awkward length (multiple kv steps).
    _check(1, 2, 16, 640, k2, 1e-1)
    # No padding needed; several heads folded per grid step.
    _check(2, 4, 32, 256, k3, 1e-1)

    print("KERNEL_OK")
</pallas_src>

<mosaic_0001>
module attributes {stable_mosaic.version = 11 : i64} {
  func.func @_attn_kernel(%arg0: i32, %arg1: i32, %arg2: i32, %arg3: memref<1x8x128xbf16, #tpu.memory_space<vmem>>, %arg4: memref<1x8x128xbf16, #tpu.memory_space<vmem>>, %arg5: memref<1x9x128xbf16, #tpu.memory_space<vmem>>, %arg6: memref<1x8x128xf32, #tpu.memory_space<vmem>>, %arg7: memref<1x1x128xf32, #tpu.memory_space<vmem>>, %arg8: memref<1x1x128xf32, #tpu.memory_space<vmem>>, %arg9: memref<1x8x128xf32, #tpu.memory_space<vmem>>) attributes {dimension_semantics = [#tpu.dimension_semantics<parallel>, #tpu.dimension_semantics<parallel>, #tpu.dimension_semantics<arbitrary>], iteration_bounds = array<i64: 4, 1, 1>, scalar_prefetch = 0 : i64, scratch_operands = 3 : i64, tpu.core_type = #tpu.core_type<tc>, window_params = [{transform_indices = @transform_0, window_bounds = array<i64: 1, 8, 128>}, {transform_indices = @transform_1, window_bounds = array<i64: 1, 8, 128>}, {transform_indices = @transform_2, window_bounds = array<i64: 1, 9, 128>}, {transform_indices = @transform_3, window_bounds = array<i64: 1, 8, 128>}]} {
    %c0_i32 = arith.constant 0 : i32
    %0 = arith.cmpi eq, %arg2, %c0_i32 : i32
    %1 = arith.extui %0 : i1 to i32
    %c0_i32_0 = arith.constant 0 : i32
    %2 = arith.cmpi ne, %1, %c0_i32_0 : i32
    scf.if %2 {
      %cst_32 = arith.constant 0xFF800000 : f32
      %44 = vector.broadcast %cst_32 : f32 to vector<1x1x128xf32>
      %c0_33 = arith.constant 0 : index
      %c0_34 = arith.constant 0 : index
      %c0_35 = arith.constant 0 : index
      %45 = vector.load %arg7[%c0_33, %c0_34, %c0_35] : memref<1x1x128xf32, #tpu.memory_space<vmem>>, vector<1x1x128xf32>
      tpu.vector_store %arg7[%c0_33, %c0_34, %c0_35], %44 {strides = array<i32>} : memref<1x1x128xf32, #tpu.memory_space<vmem>>, vector<1x1x128xf32>,
      %cst_36 = arith.constant 0.000000e+00 : f32
      %46 = vector.broadcast %cst_36 : f32 to vector<1x1x128xf32>
      %c0_37 = arith.constant 0 : index
      %c0_38 = arith.constant 0 : index
      %c0_39 = arith.constant 0 : index
      %47 = vector.load %arg8[%c0_37, %c0_38, %c0_39] : memref<1x1x128xf32, #tpu.memory_space<vmem>>, vector<1x1x128xf32>
      tpu.vector_store %arg8[%c0_37, %c0_38, %c0_39], %46 {strides = array<i32>} : memref<1x1x128xf32, #tpu.memory_space<vmem>>, vector<1x1x128xf32>,
      %cst_40 = arith.constant 0.000000e+00 : f32
      %48 = vector.broadcast %cst_40 : f32 to vector<1x8x128xf32>
      %c0_41 = arith.constant 0 : index
      %c0_42 = arith.constant 0 : index
      %c0_43 = arith.constant 0 : index
      %49 = vector.load %arg9[%c0_41, %c0_42, %c0_43] : memref<1x8x128xf32, #tpu.memory_space<vmem>>, vector<1x8x128xf32>
      tpu.vector_store %arg9[%c0_41, %c0_42, %c0_43], %48 {strides = array<i32>} : memref<1x8x128xf32, #tpu.memory_space<vmem>>, vector<1x8x128xf32>,
    } else {
    }
    %c0 = arith.constant 0 : index
    %c0_1 = arith.constant 0 : index
    %c0_2 = arith.constant 0 : index
    %3 = vector.load %arg3[%c0, %c0_1, %c0_2] : memref<1x8x128xbf16, #tpu.memory_space<vmem>>, vector<1x8x128xbf16>
    %c0_3 = arith.constant 0 : index
    %c0_4 = arith.constant 0 : index
    %c0_5 = arith.constant 0 : index
    %4 = vector.load %arg4[%c0_3, %c0_4, %c0_5] : memref<1x8x128xbf16, #tpu.memory_space<vmem>>, vector<1x8x128xbf16>
    %c0_6 = arith.constant 0 : index
    %c0_7 = arith.constant 0 : index
    %c0_8 = arith.constant 0 : index
    %5 = vector.load %arg5[%c0_6, %c0_7, %c0_8] : memref<1x9x128xbf16, #tpu.memory_space<vmem>>, vector<1x9x128xbf16>
    %cst = arith.constant dense<0.000000e+00> : vector<1x128x128xf32>
    %6 = tpu.matmul %3, %4, %cst {dimension_numbers = #tpu.dot_dimension_numbers<[1], [1], [2], [2], [0, 0, 0, 2, 1, 2], [0], [0]>} : vector<1x8x128xbf16>, vector<1x8x128xbf16>, vector<1x128x128xf32> -> vector<1x128x128xf32>
    %c0_9 = arith.constant 0 : index
    %c0_10 = arith.constant 0 : index
    %c0_11 = arith.constant 0 : index
    %7 = vector.load %arg7[%c0_9, %c0_10, %c0_11] : memref<1x1x128xf32, #tpu.memory_space<vmem>>, vector<1x1x128xf32>
    %cst_12 = arith.constant dense<0xFF800000> : vector<1x128xf32>
    %8 = vector.multi_reduction <maximumf>, %6, %cst_12 [2] : vector<1x128x128xf32> to vector<1x128xf32>
    %9 = vector.shape_cast %8 : vector<1x128xf32> to vector<1x1x128xf32>
    %10 = arith.maximumf %7, %9 : vector<1x1x128xf32>
    %11 = arith.subf %7, %10 : vector<1x1x128xf32>
    %12 = math.exp %11 : vector<1x1x128xf32>
    %13 = tpu.transpose %10, [0, 2, 1] : vector<1x1x128xf32> -> vector<1x128x1xf32>
    %14 = vector.broadcast %13 : vector<1x128x1xf32> to vector<1x128x128xf32>
    %15 = arith.subf %6, %14 : vector<1x128x128xf32>
    %16 = math.exp %15 : vector<1x128x128xf32>
    %c128_i32 = arith.constant 128 : i32
    %17 = arith.muli %arg2, %c128_i32 : i32
    %18 = tpu.iota {dimensions = array<i32: 2>} : vector<1x1x128xi32>
    %19 = vector.broadcast %17 : i32 to vector<1x1x128xi32>
    %20 = arith.addi %19, %18 : vector<1x1x128xi32>
    %c16_i32 = arith.constant 16 : i32
    %21 = vector.broadcast %c16_i32 : i32 to vector<1x1x128xi32>
    %22 = arith.cmpi slt, %20, %21 : vector<1x1x128xi32>
    %cst_13 = arith.constant 0.000000e+00 : f32
    %23 = vector.shape_cast %22 : vector<1x1x128xi1> to vector<1x1x128xi1>
    %24 = vector.broadcast %23 : vector<1x1x128xi1> to vector<1x128x128xi1>
    %25 = vector.broadcast %cst_13 : f32 to vector<1x128x128xf32>
    %26 = arith.select %24, %16, %25 : vector<1x128x128xi1>, vector<1x128x128xf32>
    %27 = arith.truncf %26 : vector<1x128x128xf32> to vector<1x128x128xbf16>
    %cst_14 = arith.constant dense<0.000000e+00> : vector<1x9x128xf32>
    %28 = tpu.matmul %5, %27, %cst_14 {dimension_numbers = #tpu.dot_dimension_numbers<[2], [2], [1], [1], [0, 0, 0, 1, 1, 1], [0], [0]>} : vector<1x9x128xbf16>, vector<1x128x128xbf16>, vector<1x9x128xf32> -> vector<1x9x128xf32>
    %c0_15 = arith.constant 0 : index
    %c0_16 = arith.constant 0 : index
    %c0_17 = arith.constant 0 : index
    %29 = vector.load %arg9[%c0_15, %c0_16, %c0_17] : memref<1x8x128xf32, #tpu.memory_space<vmem>>, vector<1x8x128xf32>
    %30 = vector.broadcast %12 : vector<1x1x128xf32> to vector<1x8x128xf32>
    %31 = arith.mulf %30, %29 : vector<1x8x128xf32>
    %32 = vector.extract_strided_slice %28 {offsets = [0, 0, 0], sizes = [1, 8, 128], strides = [1, 1, 1]} : vector<1x9x128xf32> to vector<1x8x128xf32>
    %33 = arith.addf %31, %32 : vector<1x8x128xf32>
    %c0_18 = arith.constant 0 : index
    %c0_19 = arith.constant 0 : index
    %c0_20 = arith.constant 0 : index
    %34 = vector.load %arg9[%c0_18, %c0_19, %c0_20] : memref<1x8x128xf32, #tpu.memory_space<vmem>>, vector<1x8x128xf32>
    tpu.vector_store %arg9[%c0_18, %c0_19, %c0_20], %33 {strides = array<i32>} : memref<1x8x128xf32, #tpu.memory_space<vmem>>, vector<1x8x128xf32>,
    %c0_21 = arith.constant 0 : index
    %c0_22 = arith.constant 0 : index
    %c0_23 = arith.constant 0 : index
    %35 = vector.load %arg8[%c0_21, %c0_22, %c0_23] : memref<1x1x128xf32, #tpu.memory_space<vmem>>, vector<1x1x128xf32>
    %36 = arith.mulf %12, %35 : vector<1x1x128xf32>
    %37 = vector.extract_strided_slice %28 {offsets = [0, 8, 0], sizes = [1, 1, 128], strides = [1, 1, 1]} : vector<1x9x128xf32> to vector<1x1x128xf32>
    %38 = arith.addf %36, %37 : vector<1x1x128xf32>
    %c0_24 = arith.constant 0 : index
    %c0_25 = arith.constant 0 : index
    %c0_26 = arith.constant 0 : index
    %39 = vector.load %arg8[%c0_24, %c0_25, %c0_26] : memref<1x1x128xf32, #tpu.memory_space<vmem>>, vector<1x1x128xf32>
    tpu.vector_store %arg8[%c0_24, %c0_25, %c0_26], %38 {strides = array<i32>} : memref<1x1x128xf32, #tpu.memory_space<vmem>>, vector<1x1x128xf32>,
    %c0_27 = arith.constant 0 : index
    %c0_28 = arith.constant 0 : index
    %c0_29 = arith.constant 0 : index
    %40 = vector.load %arg7[%c0_27, %c0_28, %c0_29] : memref<1x1x128xf32, #tpu.memory_space<vmem>>, vector<1x1x128xf32>
    tpu.vector_store %arg7[%c0_27, %c0_28, %c0_29], %10 {strides = array<i32>} : memref<1x1x128xf32, #tpu.memory_space<vmem>>, vector<1x1x128xf32>,
    %c0_i32_30 = arith.constant 0 : i32
    %41 = arith.cmpi eq, %arg2, %c0_i32_30 : i32
    %42 = arith.extui %41 : i1 to i32
    %c0_i32_31 = arith.constant 0 : i32
    %43 = arith.cmpi ne, %42, %c0_i32_31 : i32
    scf.if %43 {
      %c0_32 = arith.constant 0 : index
      %c0_33 = arith.constant 0 : index
      %c0_34 = arith.constant 0 : index
      %44 = vector.load %arg8[%c0_32, %c0_33, %c0_34] : memref<1x1x128xf32, #tpu.memory_space<vmem>>, vector<1x1x128xf32>
      %45 = tpu.reciprocal %44 : vector<1x1x128xf32> -> vector<1x1x128xf32>
      %c0_35 = arith.constant 0 : index
      %c0_36 = arith.constant 0 : index
      %c0_37 = arith.constant 0 : index
      %46 = vector.load %arg9[%c0_35, %c0_36, %c0_37] : memref<1x8x128xf32, #tpu.memory_space<vmem>>, vector<1x8x128xf32>
      %47 = vector.broadcast %45 : vector<1x1x128xf32> to vector<1x8x128xf32>
      %48 = arith.mulf %46, %47 : vector<1x8x128xf32>
      %c0_38 = arith.constant 0 : index
      %c0_39 = arith.constant 0 : index
      %c0_40 = arith.constant 0 : index
      %49 = vector.load %arg6[%c0_38, %c0_39, %c0_40] : memref<1x8x128xf32, #tpu.memory_space<vmem>>, vector<1x8x128xf32>
      tpu.vector_store %arg6[%c0_38, %c0_39, %c0_40], %48 {strides = array<i32>} : memref<1x8x128xf32, #tpu.memory_space<vmem>>, vector<1x8x128xf32>,
    } else {
    }
    return
  }
  func.func @transform_0(%arg0: i32, %arg1: i32, %arg2: i32) -> (i32, i32, i32) {
    %c0_i32 = arith.constant 0 : i32
    %c0_i32_0 = arith.constant 0 : i32
    return %arg0, %c0_i32, %arg1 : i32, i32, i32
  }
  func.func @transform_1(%arg0: i32, %arg1: i32, %arg2: i32) -> (i32, i32, i32) {
    %c0_i32 = arith.constant 0 : i32
    %c0_i32_0 = arith.constant 0 : i32
    return %arg0, %c0_i32, %arg2 : i32, i32, i32
  }
  func.func @transform_2(%arg0: i32, %arg1: i32, %arg2: i32) -> (i32, i32, i32) {
    %c0_i32 = arith.constant 0 : i32
    %c0_i32_0 = arith.constant 0 : i32
    return %arg0, %c0_i32, %arg2 : i32, i32, i32
  }
  func.func @transform_3(%arg0: i32, %arg1: i32, %arg2: i32) -> (i32, i32, i32) {
    %c0_i32 = arith.constant 0 : i32
    %c0_i32_0 = arith.constant 0 : i32
    return %arg0, %c0_i32, %arg1 : i32, i32, i32
  }
}

</mosaic_0001>

<bundles_post_ra>
// kernel: tpu_custom_call.1
= control target key start
LH: loop header
LB: loop body
LE: loop exit
PB: predicated region body
PF: predicated region fallthrough
CT: control target
= control target key end

     0   :  { %8 = vsyncpa [#allocation6], 0  ;;  %s1704_s0 = inlined_call_operand.vmem [shape: bf16[4,8,128], index: 0, kind: input, shape index: {}]   ;;  %s1705_s1 = inlined_call_operand.vmem [shape: bf16[4,8,128], index: 1, kind: input, shape index: {}]   ;;  %s1706_s2 = inlined_call_operand.vmem [shape: bf16[4,9,128], index: 2, kind: input, shape index: {}]   ;;  %s1707_s3 = inlined_call_operand.hbm [shape: f32[4,8,128], index: 3, kind: output, shape index: {}]  }
   0x1   :  { %10 = vsyncpa [#allocation6 + $0x1], 0  ;;  %s1462_s12 = smov 0   ;;  %s1464_s13 = smov 0  }
   0x2   :  { %s1466_s14 = smov 0   ;;  %s1468_s15 = smov 0  }
   0x3   :  { %s1470_s16 = smov 0   ;;  %s1472_s17 = smov 0  }
   0x4 LB: > { %s1233_s18 = sadd.s32 4294967295, %s1437_s17   ;;  %s1234_s19 = sadd.s32 4294967294, %s1437_s17   ;;  %s1437_s17 = sphi %s1472_s17, %s16_s17   ;;  %s1433_s16 = sphi %s1470_s16, %s1714_s16   ;;  %s1429_s15 = sphi %s1468_s15, %s1713_s15   ;;  %s1425_s14 = sphi %s1466_s14, %s1712_s14   ;;  %s1421_s13 = sphi %s1464_s13, %s1711_s13   ;;  %s1417_s12 = sphi %s1462_s12, %s1710_s12  }
   0x5   : > { %s35_s20 = sadd.s32 1, %s1433_s16  ;;  %s128_s21 = sadd.s32 1, %s1425_s14 }
   0x6   : > { %p37_p0 = scmp.ge.s32.totalorder %s35_s20, 4  ;;  %p138_p1 = scmp.ne.s32.totalorder %s1425_s14, %s1421_s13 }
   0x7   : > { %p139_p2 = scmp.eq.s32.totalorder %s1233_s18, 3  ;;  %p144_p3 = scmp.ne.s32.totalorder %s1421_s13, %s1417_s12 }
   0x8   : > { %s1716_s20 = smov (%p37_p0, %s35_s20), 0  ;;  %p145_p5 = scmp.eq.s32.totalorder %s1234_s19, 3 }
   0x9   : > { %p1502_p4 = por %p139_p2, %p138_p1  ;;  %s123_s23 = ssub.s32 %s1433_s16, %s1716_s20 }
   0xa   : > { %p1237_p6 = scmp.ge.s32.totalorder %s1437_s17, 1  ;;  %p126_p7 = scmp.eq.s32.totalorder %s123_s23, 0 }
   0xb   : > { %p1509_p8 = por %p145_p5, %p144_p3  ;;  %p194_p9 = scmp.lt.s32.totalorder %s1437_s17, 5 }
   0xc   : > { %s1515_s25 = scalar_select %p126_p7, %s1425_s14, %s128_s21  }
   0xd   : > { %p195_p10 = pnand %p1237_p6, %p194_p9 }
   0xe   : > { %p235_p11 = scmp.lt.s32.totalorder (!%p195_p10), %s1429_s15, 3  ;;  %s232_s11 = sand.u32 (!%p195_p10), 1, %s1421_s13  }
   0xf   : > { %198 = sbr.rel (%p195_p10) target bundleno = 1413 (0x585), region = 32  ;;  %s1238_s18 = sshll.u32 (!%p195_p10), %s232_s11, 3 }
  0x10   : > { %s1256_s19 = sshll.u32 (!%p195_p10), %s1429_s15, 3  ;;  %s1110_s29 = scalar_lea.sflag (!%p195_p10), [#allocation6], %s232_s11 }
  0x14   : > { %s1519_s26 = scalar_select %p235_p11, %s1429_s15, 3  ;;  %vm310_vm0 = vcmask 1043456   ;;  %vm285_vm1 = vcmask 64512   ;;  %v1439_v46 = vmov 0   ;;  %vm744_vm2 = vcmask 130112  }
  0x15   : > { %1320 = vset.pattern.permute.xlu2 %v1439_v46  ;;  %1321 = vset.pattern.permute.xlu1 %v1439_v46  ;;  %vm748_vm3 = vcmask 195712   ;;  %vm752_vm4 = vcmask 261312   ;;  %vm756_vm5 = vcmask 326912   ;;  %vm760_vm6 = vcmask 392512  }
  0x16   : > { %s1239_s27 = sshll.u32 %s1519_s26, 2  ;;  %vm764_vm7 = vcmask 458112   ;;  %vm768_vm8 = vcmask 523712   ;;  %vm772_vm9 = vcmask 589312   ;;  %vm776_vm10 = vcmask 654912   ;;  %s1259_s7 = sshll.u32 %s1519_s26, 3 }
  0x17   : > { %s241_s30 = scalar_lea.vmem %s1704_s0, %s1239_s27  ;;  %s248_s6 = scalar_lea.vmem %s1705_s1, %s1239_s27  ;;  %vm780_vm11 = vcmask 720512   ;;  %vm784_vm12 = vcmask 786112   ;;  %vm788_vm13 = vcmask 851712   ;;  %vm792_vm14 = vcmask 917312  }
  0x18   : > { %v265_v0 = vld [vmem:[%s241_s30] sm:$0xf]  ;;  %vm796_vm15 = vcmask 982912   ;;  %s256_s10 = scalar_lea.vmem %s1706_s2, %s1259_s7  ;;  %s1121_s26 = scalar_lea.hbm %s1707_s3, %s1256_s19 }
  0x19   : > { %v266_v1 = vld [vmem:[%s248_s6] sm:$0xf]  ;;  %269 = vxpose.xlu0.c.b16.start.end [1/1] (short) %v265_v0, 128  ;;  %s234_s27 = scalar_lea.vmem [#allocation5], %s1238_s18  ;;  %s1125_s15 = sshll.u32 %s1121_s26, 4  ;;  %s1126_s15 = int_to_ptr.hbm [resolvable:$true] %s1125_s15 }
  0x1a   : > { %v312_v2 = vsel %vm310_vm0, %v266_v1, 0  ;;  %vm800_vm0 = vcmask 1048512   ;;  %s1123_s28 = sshll.u32 %s234_s27, 4  ;;  %s1373_s30 = sshra.s32 %s1126_s15, 4  ;;  %s1124_s28 = int_to_ptr.vmem [resolvable:$true] %s1123_s28  ;;  %s1374_s30 = int_to_ptr.hbm [resolvable:$true] %s1373_s30 }
  0x1b   : > { %321 = vmatpush.bf16.msra.mxu0 %v312_v2  ;;  %1261 = vmatpush.bf16.msra.mxu2 %v312_v2  ;;  %s1375_s4 = scalar_lea.hbm %s1374_s30, 8  ;;  %s1379_s7 = scalar_lea.hbm %s1707_s3, 32 }
  0x1c   : > { %p1376_p12 = scmp.ne.s32.totalorder %s1374_s30, %s1375_s4  ;;  %p1380_p1 = scmp.lt.s32.totalorder %s1374_s30, %s1707_s3 }
  0x1d   : > { %p1381_p2 = scmp.lt.s32.totalorder %s1379_s7, %s1375_s4 }
  0x1e   : > { %p1377_p13 = pnand %p1376_p12, %p1502_p4 }
  0x1f   : > { %p1382_p3 = por %p1381_p2, %p1380_p1 }
  0x20   : > { %p1378_p0 = pneg %p1377_p13 }
  0x22   : > { %p1383_p5 = pnand %p1382_p3, %p1378_p0 }
  0x80   : > { %1322 = vset.pattern.permute.xlu0 %v1439_v46 }
  0xc5   : > { %v277_v3 = vpop.trf.xlu0 }
  0xc6   : > { %1243 = vmatmul.msk.bf16.vlgmr.msra.gmra.mxu0 %vm285_vm1, %v277_v3 }
  0xd5   : > { %v278_v4 = vpop.trf.xlu0 }
  0xd6   : > { %1244 = vmatmul.msk.bf16.gmra.mxu0 %vm285_vm1, %v278_v4 }
  0xe5   : > { %v279_v5 = vpop.trf.xlu0 }
  0xe6   : > { %1245 = vmatmul.msk.bf16.gmra.mxu0 %vm285_vm1, %v279_v5 }
  0xf5   : > { %v280_v6 = vpop.trf.xlu0 }
  0xf6   : > { %1246 = vmatmul.msk.bf16.gmra.mxu0 %vm285_vm1, %v280_v6 }
 0x105   : > { %v281_v7 = vpop.trf.xlu0 }
 0x106   : > { %1247 = vmatmul.msk.bf16.vlgmr.msra.gmra.mxu2 %vm285_vm1, %v281_v7 }
 0x115   : > { %v282_v8 = vpop.trf.xlu0 }
 0x116   : > { %1248 = vmatmul.msk.bf16.gmra.mxu2 %vm285_vm1, %v282_v8 }
 0x125   : > { %v283_v9 = vpop.trf.xlu0 }
 0x126   : > { %1249 = vmatmul.msk.bf16.gmra.mxu2 %vm285_vm1, %v283_v9 }
 0x135   : > { %v284_v10 = vpop.trf.xlu0 }
 0x136   : > { %1250 = vmatmul.msk.bf16.gmra.mxu2 %vm285_vm1, %v284_v10 }
 0x143   : > { %v1536_v11 = vpop.f32.mrf.mxu0 }
 0x144   : > { %364 = vmax.xlane.f32.xlu0 %v1536_v11 }
 0x14b   : > { %v1539_v12 = vpop.f32.mrf.mxu0 }
 0x14c   : > { %366 = vmax.xlane.f32.xlu1 %v1539_v12 }
 0x153   : > { %v1542_v13 = vpop.f32.mrf.mxu0 }
 0x154   : > { %368 = vmax.xlane.f32.xlu1 %v1542_v13 }
 0x15b   : > { %v1545_v14 = vpop.f32.mrf.mxu0 }
 0x15c   : > { %370 = vmax.xlane.f32.xlu2 %v1545_v14 }
 0x163   : > { %v1548_v15 = vpop.f32.mrf.mxu0 }
 0x164   : > { %372 = vmax.xlane.f32.xlu2 %v1548_v15 }
 0x16b   : > { %v1551_v16 = vpop.f32.mrf.mxu0 }
 0x16c   : > { %374 = vmax.xlane.f32.xlu1 %v1551_v16 }
 0x173   : > { %v1554_v17 = vpop.f32.mrf.mxu0 }
 0x174   : > { %376 = vmax.xlane.f32.xlu2 %v1554_v17 }
 0x17b   : > { %v1557_v18 = vpop.f32.mrf.mxu0 }
 0x17c   : > { %378 = vmax.xlane.f32.xlu1 %v1557_v18 }
 0x189   : > { %v1560_v19 = vpop.f32.mrf.mxu2 }
 0x18a   : > { %380 = vmax.xlane.f32.xlu2 %v1560_v19 }
 0x191   : > { %v1563_v20 = vpop.f32.mrf.mxu2 }
 0x192   : > { %382 = vmax.xlane.f32.xlu1 %v1563_v20 }
 0x199   : > { %v1566_v21 = vpop.f32.mrf.mxu2 }
 0x19a   : > { %384 = vmax.xlane.f32.xlu2 %v1566_v21 }
 0x1a1   : > { %v1569_v22 = vpop.f32.mrf.mxu2 }
 0x1a2   : > { %386 = vmax.xlane.f32.xlu1 %v1569_v22 }
 0x1a9   : > { %v1572_v23 = vpop.f32.mrf.mxu2 }
 0x1aa   : > { %388 = vmax.xlane.f32.xlu2 %v1572_v23 }
 0x1b1   : > { %v1575_v24 = vpop.f32.mrf.mxu2 }
 0x1b2   : > { %390 = vmax.xlane.f32.xlu1 %v1575_v24 }
 0x1b7   : > { %v365_v25 = vpop.xlane.xlu0 %364 }
 0x1b8   : > { %v412_v26 = vperm.slane %v365_v25, 0  ;;  %v413_v27 = vperm.slane %v365_v25, 1  ;;  %v414_v28 = vperm.slane %v365_v25, 2  ;;  %v415_v29 = vperm.slane %v365_v25, 3 }
 0x1b9   : > { %v1578_v30 = vpop.f32.mrf.mxu2  ;;  %v416_v31 = vperm.slane %v365_v25, 4  ;;  %v417_v32 = vperm.slane %v365_v25, 5  ;;  %v418_v33 = vperm.slane %v365_v25, 6  ;;  %v419_v34 = vperm.slane %v365_v25, 7 }
 0x1ba   : > { %540 = vst [vmem:[#allocation1] ss:$9 sm:$0xff] %v412_v26  ;;  %392 = vmax.xlane.f32.xlu2 %v1578_v30 }
 0x1bb   : > { %542 = vst [vmem:[#allocation1 + $0x1] ss:$9 sm:$0xff] %v413_v27 }
 0x1bc   : > { %544 = vst [vmem:[#allocation1 + $0x2] ss:$9 sm:$0xff] %v414_v28 }
 0x1bd   : > { %546 = vst [vmem:[#allocation1 + $0x3] ss:$9 sm:$0xff] %v415_v29 }
 0x1be   : > { %548 = vst [vmem:[#allocation1 + $0x4] ss:$9 sm:$0xff] %v416_v31 }
 0x1bf   : > { %550 = vst [vmem:[#allocation1 + $0x5] ss:$9 sm:$0xff] %v417_v32  ;;  %v367_v36 = vpop.xlane.xlu1 %366 }
 0x1c0   : > { %552 = vst [vmem:[#allocation1 + $0x6] ss:$9 sm:$0xff] %v418_v33  ;;  %v420_v37 = vperm.slane %v367_v36, 0  ;;  %v421_v38 = vperm.slane %v367_v36, 1  ;;  %v422_v39 = vperm.slane %v367_v36, 2  ;;  %v423_v41 = vperm.slane %v367_v36, 3 }
 0x1c1   : > { %554 = vst [vmem:[#allocation1 + $0x7] ss:$9 sm:$0xff] %v419_v34  ;;  %v1581_v35 = vpop.f32.mrf.mxu2  ;;  %v424_v42 = vperm.slane %v367_v36, 4  ;;  %v425_v43 = vperm.slane %v367_v36, 5  ;;  %v426_v44 = vperm.slane %v367_v36, 6  ;;  %v427_v45 = vperm.slane %v367_v36, 7 }
 0x1c2   : > { %394 = vmax.xlane.f32.xlu1 %v1581_v35 }
 0x1c7   : > { %v369_v47 = vpop.xlane.xlu1 %368 }
 0x1c8   : > { %v555_v40 = vld [vmem:[#allocation1] sm:$0xff]  ;;  %v428_v48 = vperm.slane %v369_v47, 0  ;;  %v429_v49 = vperm.slane %v369_v47, 1  ;;  %v430_v50 = vperm.slane %v369_v47, 2  ;;  %v431_v52 = vperm.slane %v369_v47, 3 }
 0x1c9   : > { %556 = vst [vmem:[#allocation1] ss:$9 sm:$0xff] %v420_v37  ;;  %v432_v53 = vperm.slane %v369_v47, 4  ;;  %v433_v54 = vperm.slane %v369_v47, 5  ;;  %v434_v55 = vperm.slane %v369_v47, 6  ;;  %v435_v56 = vperm.slane %v369_v47, 7 }
 0x1ca   : > { %557 = vst [vmem:[#allocation1 + $0x1] ss:$9 sm:$0xff] %v421_v38 }
 0x1cb   : > { %558 = vst [vmem:[#allocation1 + $0x2] ss:$9 sm:$0xff] %v422_v39 }
 0x1cc   : > { %559 = vst [vmem:[#allocation1 + $0x3] ss:$9 sm:$0xff] %v423_v41 }
 0x1cd   : > { %560 = vst [vmem:[#allocation1 + $0x4] ss:$9 sm:$0xff] %v424_v42 }
 0x1ce   : > { %561 = vst [vmem:[#allocation1 + $0x5] ss:$9 sm:$0xff] %v425_v43 }
 0x1cf   : > { %562 = vst [vmem:[#allocation1 + $0x6] ss:$9 sm:$0xff] %v426_v44  ;;  %v371_v57 = vpop.xlane.xlu2 %370 }
 0x1d0   : > { %563 = vst [vmem:[#allocation1 + $0x7] ss:$9 sm:$0xff] %v427_v45  ;;  %v436_v58 = vperm.slane %v371_v57, 0  ;;  %v437_v59 = vperm.slane %v371_v57, 1  ;;  %v438_v60 = vperm.slane %v371_v57, 2  ;;  %v439_v62 = vperm.slane %v371_v57, 3 }
 0x1d1   : > { %v440_v63 = vperm.slane %v371_v57, 4  ;;  %v441_v0 = vperm.slane %v371_v57, 5  ;;  %v442_v1 = vperm.slane %v371_v57, 6  ;;  %v443_v2 = vperm.slane %v371_v57, 7 }
 0x1d2   : > { %692 = vperm.xlu2 %1320, %v555_v40  }
 0x1d7   : > { %v564_v51 = vld [vmem:[#allocation1] sm:$0xff]  ;;  %v373_v3 = vpop.xlane.xlu2 %372 }
 0x1d8   : > { %565 = vst [vmem:[#allocation1] ss:$9 sm:$0xff] %v428_v48  ;;  %v444_v4 = vperm.slane %v373_v3, 0  ;;  %v445_v5 = vperm.slane %v373_v3, 1  ;;  %v446_v6 = vperm.slane %v373_v3, 2  ;;  %v447_v8 = vperm.slane %v373_v3, 3 }
 0x1d9   : > { %566 = vst [vmem:[#allocation1 + $0x1] ss:$9 sm:$0xff] %v429_v49  ;;  %v448_v9 = vperm.slane %v373_v3, 4  ;;  %v449_v10 = vperm.slane %v373_v3, 5  ;;  %v450_v25 = vperm.slane %v373_v3, 6  ;;  %v451_v26 = vperm.slane %v373_v3, 7 }
 0x1da   : > { %567 = vst [vmem:[#allocation1 + $0x2] ss:$9 sm:$0xff] %v430_v50 }
 0x1db   : > { %568 = vst [vmem:[#allocation1 + $0x3] ss:$9 sm:$0xff] %v431_v52  ;;  %695 = vperm.xlu1 %1321, %v564_v51  }
 0x1dc   : > { %569 = vst [vmem:[#allocation1 + $0x4] ss:$9 sm:$0xff] %v432_v53 }
 0x1dd   : > { %570 = vst [vmem:[#allocation1 + $0x5] ss:$9 sm:$0xff] %v433_v54 }
 0x1de   : > { %571 = vst [vmem:[#allocation1 + $0x6] ss:$9 sm:$0xff] %v434_v55 }
 0x1df   : > { %572 = vst [vmem:[#allocation1 + $0x7] ss:$9 sm:$0xff] %v435_v56  ;;  %v375_v27 = vpop.xlane.xlu1 %374 }
 0x1e0   : > { %v452_v28 = vperm.slane %v375_v27, 0  ;;  %v453_v29 = vperm.slane %v375_v27, 1  ;;  %v454_v31 = vperm.slane %v375_v27, 2  ;;  %v455_v33 = vperm.slane %v375_v27, 3 }
 0x1e1   : > { %v456_v34 = vperm.slane %v375_v27, 4  ;;  %v457_v36 = vperm.slane %v375_v27, 5  ;;  %v458_v37 = vperm.slane %v375_v27, 6  ;;  %v459_v38 = vperm.slane %v375_v27, 7 }
 0x1e6   : > { %v573_v61 = vld [vmem:[#allocation1] sm:$0xff] }
 0x1e7   : > { %574 = vst [vmem:[#allocation1] ss:$9 sm:$0xff] %v436_v58  ;;  %698 = vperm.xlu2 %1320, %v573_v61   ;;  %v377_v39 = vpop.xlane.xlu2 %376 }
 0x1e8   : > { %575 = vst [vmem:[#allocation1 + $0x1] ss:$9 sm:$0xff] %v437_v59  ;;  %v460_v40 = vperm.slane %v377_v39, 0  ;;  %v461_v41 = vperm.slane %v377_v39, 1  ;;  %v462_v42 = vperm.slane %v377_v39, 2  ;;  %v463_v44 = vperm.slane %v377_v39, 3 }
 0x1e9   : > { %576 = vst [vmem:[#allocation1 + $0x2] ss:$9 sm:$0xff] %v438_v60  ;;  %v464_v45 = vperm.slane %v377_v39, 4  ;;  %v465_v46 = vperm.slane %v377_v39, 5  ;;  %v466_v47 = vperm.slane %v377_v39, 6  ;;  %v467_v48 = vperm.slane %v377_v39, 7 }
 0x1ea   : > { %577 = vst [vmem:[#allocation1 + $0x3] ss:$9 sm:$0xff] %v439_v62 }
 0x1eb   : > { %578 = vst [vmem:[#allocation1 + $0x4] ss:$9 sm:$0xff] %v440_v63 }
 0x1ec   : > { %579 = vst [vmem:[#allocation1 + $0x5] ss:$9 sm:$0xff] %v441_v0 }
 0x1ed   : > { %580 = vst [vmem:[#allocation1 + $0x6] ss:$9 sm:$0xff] %v442_v1 }
 0x1ee   : > { %581 = vst [vmem:[#allocation1 + $0x7] ss:$9 sm:$0xff] %v443_v2 }
 0x1ef   : > { %v379_v49 = vpop.xlane.xlu1 %378 }
 0x1f0   : > { %v468_v50 = vperm.slane %v379_v49, 0  ;;  %v469_v51 = vperm.slane %v379_v49, 1  ;;  %v470_v52 = vperm.slane %v379_v49, 2  ;;  %v471_v54 = vperm.slane %v379_v49, 3 }
 0x1f1   : > { %v472_v55 = vperm.slane %v379_v49, 4  ;;  %v473_v56 = vperm.slane %v379_v49, 5  ;;  %v474_v57 = vperm.slane %v379_v49, 6  ;;  %v475_v58 = vperm.slane %v379_v49, 7 }
 0x1f5   : > { %v582_v7 = vld [vmem:[#allocation1] sm:$0xff] }
 0x1f6   : > { %583 = vst [vmem:[#allocation1] ss:$9 sm:$0xff] %v444_v4  ;;  %701 = vperm.xlu2 %1320, %v582_v7  }
 0x1f7   : > { %584 = vst [vmem:[#allocation1 + $0x1] ss:$9 sm:$0xff] %v445_v5 }
 0x1f8   : > { %585 = vst [vmem:[#allocation1 + $0x2] ss:$9 sm:$0xff] %v446_v6 }
 0x1f9   : > { %586 = vst [vmem:[#allocation1 + $0x3] ss:$9 sm:$0xff] %v447_v8 }
 0x1fa   : > { %587 = vst [vmem:[#allocation1 + $0x4] ss:$9 sm:$0xff] %v448_v9 }
 0x1fb   : > { %588 = vst [vmem:[#allocation1 + $0x5] ss:$9 sm:$0xff] %v449_v10 }
 0x1fc   : > { %589 = vst [vmem:[#allocation1 + $0x6] ss:$9 sm:$0xff] %v450_v25 }
 0x1fd   : > { %590 = vst [vmem:[#allocation1 + $0x7] ss:$9 sm:$0xff] %v451_v26  ;;  %v381_v59 = vpop.xlane.xlu2 %380 }
 0x1fe   : > { %v476_v60 = vperm.slane %v381_v59, 0  ;;  %v477_v61 = vperm.slane %v381_v59, 1  ;;  %v478_v62 = vperm.slane %v381_v59, 2  ;;  %v479_v0 = vperm.slane %v381_v59, 3 }
 0x1ff   : > { %v480_v1 = vperm.slane %v381_v59, 4  ;;  %v481_v2 = vperm.slane %v381_v59, 5  ;;  %v482_v3 = vperm.slane %v381_v59, 6  ;;  %v483_v4 = vperm.slane %v381_v59, 7 }
 0x204   : > { %v591_v32 = vld [vmem:[#allocation1] sm:$0xff] }
 0x205   : > { %592 = vst [vmem:[#allocation1] ss:$9 sm:$0xff] %v452_v28  ;;  %704 = vperm.xlu1 %1321, %v591_v32   ;;  %v383_v5 = vpop.xlane.xlu1 %382 }
 0x206   : > { %593 = vst [vmem:[#allocation1 + $0x1] ss:$9 sm:$0xff] %v453_v29  ;;  %v484_v6 = vperm.slane %v383_v5, 0  ;;  %v485_v7 = vperm.slane %v383_v5, 1  ;;  %v486_v8 = vperm.slane %v383_v5, 2  ;;  %v487_v10 = vperm.slane %v383_v5, 3 }
 0x207   : > { %594 = vst [vmem:[#allocation1 + $0x2] ss:$9 sm:$0xff] %v454_v31  ;;  %v488_v25 = vperm.slane %v383_v5, 4  ;;  %v489_v26 = vperm.slane %v383_v5, 5  ;;  %v490_v27 = vperm.slane %v383_v5, 6  ;;  %v491_v28 = vperm.slane %v383_v5, 7 }
 0x208   : > { %595 = vst [vmem:[#allocation1 + $0x3] ss:$9 sm:$0xff] %v455_v33 }
 0x209   : > { %596 = vst [vmem:[#allocation1 + $0x4] ss:$9 sm:$0xff] %v456_v34 }
 0x20a   : > { %597 = vst [vmem:[#allocation1 + $0x5] ss:$9 sm:$0xff] %v457_v36 }
 0x20b   : > { %598 = vst [vmem:[#allocation1 + $0x6] ss:$9 sm:$0xff] %v458_v37 }
 0x20c   : > { %599 = vst [vmem:[#allocation1 + $0x7] ss:$9 sm:$0xff] %v459_v38 }
 0x20d   : > { %v385_v29 = vpop.xlane.xlu2 %384 }
 0x20e   : > { %v492_v31 = vperm.slane %v385_v29, 0  ;;  %v493_v32 = vperm.slane %v385_v29, 1  ;;  %v494_v33 = vperm.slane %v385_v29, 2  ;;  %v495_v36 = vperm.slane %v385_v29, 3 }
 0x20f   : > { %v496_v37 = vperm.slane %v385_v29, 4  ;;  %v497_v38 = vperm.slane %v385_v29, 5  ;;  %v498_v39 = vperm.slane %v385_v29, 6 }
 0x213   : > { %v600_v43 = vld [vmem:[#allocation1] sm:$0xff] }
 0x214   : > { %601 = vst [vmem:[#allocation1] ss:$9 sm:$0xff] %v460_v40  ;;  %707 = vperm.xlu2 %1320, %v600_v43   ;;  %v499_v40 = vperm.slane %v385_v29, 7 }
 0x215   : > { %602 = vst [vmem:[#allocation1 + $0x1] ss:$9 sm:$0xff] %v461_v41  ;;  %v387_v41 = vpop.xlane.xlu1 %386 }
 0x216   : > { %603 = vst [vmem:[#allocation1 + $0x2] ss:$9 sm:$0xff] %v462_v42  ;;  %v500_v42 = vperm.slane %v387_v41, 0  ;;  %v501_v43 = vperm.slane %v387_v41, 1  ;;  %v506_v49 = vperm.slane %v387_v41, 6 }
 0x217   : > { %604 = vst [vmem:[#allocation1 + $0x3] ss:$9 sm:$0xff] %v463_v44  ;;  %v502_v44 = vperm.slane %v387_v41, 2 }
 0x218   : > { %605 = vst [vmem:[#allocation1 + $0x4] ss:$9 sm:$0xff] %v464_v45 }
 0x219   : > { %606 = vst [vmem:[#allocation1 + $0x5] ss:$9 sm:$0xff] %v465_v46  ;;  %v503_v46 = vperm.slane %v387_v41, 3 }
 0x21a   : > { %607 = vst [vmem:[#allocation1 + $0x6] ss:$9 sm:$0xff] %v466_v47  ;;  %v504_v47 = vperm.slane %v387_v41, 4 }
 0x21b   : > { %608 = vst [vmem:[#allocation1 + $0x7] ss:$9 sm:$0xff] %v467_v48  ;;  %v505_v48 = vperm.slane %v387_v41, 5 }
 0x222   : > { %v609_v53 = vld [vmem:[#allocation1] sm:$0xff] }
 0x223   : > { %610 = vst [vmem:[#allocation1] ss:$9 sm:$0xff] %v468_v50  ;;  %710 = vperm.xlu1 %1321, %v609_v53   ;;  %v507_v50 = vperm.slane %v387_v41, 7 }
 0x224   : > { %611 = vst [vmem:[#allocation1 + $0x1] ss:$9 sm:$0xff] %v469_v51  ;;  %v389_v51 = vpop.xlane.xlu2 %388 }
 0x225   : > { %612 = vst [vmem:[#allocation1 + $0x2] ss:$9 sm:$0xff] %v470_v52  ;;  %v508_v52 = vperm.slane %v389_v51, 0  ;;  %v509_v53 = vperm.slane %v389_v51, 1  ;;  %v514_v59 = vperm.slane %v389_v51, 6 }
 0x226   : > { %613 = vst [vmem:[#allocation1 + $0x3] ss:$9 sm:$0xff] %v471_v54  ;;  %v510_v54 = vperm.slane %v389_v51, 2 }
 0x227   : > { %614 = vst [vmem:[#allocation1 + $0x4] ss:$9 sm:$0xff] %v472_v55 }
 0x228   : > { %615 = vst [vmem:[#allocation1 + $0x5] ss:$9 sm:$0xff] %v473_v56  ;;  %v511_v56 = vperm.slane %v389_v51, 3 }
 0x229   : > { %616 = vst [vmem:[#allocation1 + $0x6] ss:$9 sm:$0xff] %v474_v57  ;;  %v512_v57 = vperm.slane %v389_v51, 4 }
 0x22a   : > { %617 = vst [vmem:[#allocation1 + $0x7] ss:$9 sm:$0xff] %v475_v58  ;;  %v513_v58 = vperm.slane %v389_v51, 5 }
 0x231   : > { %v618_v63 = vld [vmem:[#allocation1] sm:$0xff] }
 0x232   : > { %713 = vperm.xlu2 %1320, %v618_v63   ;;  %619 = vst [vmem:[#allocation1] ss:$9 sm:$0xff] %v476_v60  ;;  %v515_v60 = vperm.slane %v389_v51, 7 }
 0x233   : > { %620 = vst [vmem:[#allocation1 + $0x1] ss:$9 sm:$0xff] %v477_v61  ;;  %v391_v61 = vpop.xlane.xlu1 %390 }
 0x234   : > { %621 = vst [vmem:[#allocation1 + $0x2] ss:$9 sm:$0xff] %v478_v62  ;;  %v516_v62 = vperm.slane %v391_v61, 0  ;;  %v517_v63 = vperm.slane %v391_v61, 1  ;;  %v522_v5 = vperm.slane %v391_v61, 6 }
 0x235   : > { %622 = vst [vmem:[#allocation1 + $0x3] ss:$9 sm:$0xff] %v479_v0  ;;  %v518_v0 = vperm.slane %v391_v61, 2 }
 0x236   : > { %623 = vst [vmem:[#allocation1 + $0x4] ss:$9 sm:$0xff] %v480_v1 }
 0x237   : > { %624 = vst [vmem:[#allocation1 + $0x5] ss:$9 sm:$0xff] %v481_v2  ;;  %v519_v2 = vperm.slane %v391_v61, 3 }
 0x238   : > { %625 = vst [vmem:[#allocation1 + $0x6] ss:$9 sm:$0xff] %v482_v3  ;;  %v520_v3 = vperm.slane %v391_v61, 4 }
 0x239   : > { %626 = vst [vmem:[#allocation1 + $0x7] ss:$9 sm:$0xff] %v483_v4  ;;  %v521_v4 = vperm.slane %v391_v61, 5 }
 0x240   : > { %v627_v9 = vld [vmem:[#allocation1] sm:$0xff] }
 0x241   : > { %628 = vst [vmem:[#allocation1] ss:$9 sm:$0xff] %v484_v6  ;;  %716 = vperm.xlu1 %1321, %v627_v9   ;;  %v523_v6 = vperm.slane %v391_v61, 7 }
 0x242   : > { %629 = vst [vmem:[#allocation1 + $0x1] ss:$9 sm:$0xff] %v485_v7  ;;  %v393_v7 = vpop.xlane.xlu2 %392 }
 0x243   : > { %630 = vst [vmem:[#allocation1 + $0x2] ss:$9 sm:$0xff] %v486_v8  ;;  %v524_v8 = vperm.slane %v393_v7, 0  ;;  %v525_v9 = vperm.slane %v393_v7, 1  ;;  %v530_v29 = vperm.slane %v393_v7, 6 }
 0x244   : > { %631 = vst [vmem:[#allocation1 + $0x3] ss:$9 sm:$0xff] %v487_v10  ;;  %v526_v10 = vperm.slane %v393_v7, 2 }
 0x245   : > { %632 = vst [vmem:[#allocation1 + $0x4] ss:$9 sm:$0xff] %v488_v25  ;;  %v527_v25 = vperm.slane %v393_v7, 3 }
 0x246   : > { %633 = vst [vmem:[#allocation1 + $0x5] ss:$9 sm:$0xff] %v489_v26 }
 0x247   : > { %634 = vst [vmem:[#allocation1 + $0x6] ss:$9 sm:$0xff] %v490_v27  ;;  %v528_v27 = vperm.slane %v393_v7, 4 }
 0x248   : > { %635 = vst [vmem:[#allocation1 + $0x7] ss:$9 sm:$0xff] %v491_v28  ;;  %v529_v28 = vperm.slane %v393_v7, 5 }
 0x24f   : > { %v636_v34 = vld [vmem:[#allocation1] sm:$0xff] }
 0x250   : > { %637 = vst [vmem:[#allocation1] ss:$9 sm:$0xff] %v492_v31  ;;  %719 = vperm.xlu2 %1320, %v636_v34   ;;  %v531_v31 = vperm.slane %v393_v7, 7 }
 0x251   : > { %638 = vst [vmem:[#allocation1 + $0x1] ss:$9 sm:$0xff] %v493_v32  ;;  %v395_v32 = vpop.xlane.xlu1 %394 }
 0x252   : > { %639 = vst [vmem:[#allocation1 + $0x2] ss:$9 sm:$0xff] %v494_v33  ;;  %v532_v33 = vperm.slane %v395_v32, 0  ;;  %v533_v34 = vperm.slane %v395_v32, 1  ;;  %v538_v41 = vperm.slane %v395_v32, 6 }
 0x253   : > { %640 = vst [vmem:[#allocation1 + $0x3] ss:$9 sm:$0xff] %v495_v36  ;;  %v534_v36 = vperm.slane %v395_v32, 2 }
 0x254   : > { %641 = vst [vmem:[#allocation1 + $0x4] ss:$9 sm:$0xff] %v496_v37  ;;  %v535_v37 = vperm.slane %v395_v32, 3 }
 0x255   : > { %642 = vst [vmem:[#allocation1 + $0x5] ss:$9 sm:$0xff] %v497_v38 }
 0x256   : > { %643 = vst [vmem:[#allocation1 + $0x6] ss:$9 sm:$0xff] %v498_v39  ;;  %v536_v39 = vperm.slane %v395_v32, 4 }
 0x257   : > { %644 = vst [vmem:[#allocation1 + $0x7] ss:$9 sm:$0xff] %v499_v40  ;;  %v537_v40 = vperm.slane %v395_v32, 5 }
 0x25e   : > { %v645_v45 = vld [vmem:[#allocation1] sm:$0xff] }
 0x25f   : > { %646 = vst [vmem:[#allocation1] ss:$9 sm:$0xff] %v500_v42  ;;  %722 = vperm.xlu1 %1321, %v645_v45   ;;  %v539_v42 = vperm.slane %v395_v32, 7 }
 0x260   : > { %647 = vst [vmem:[#allocation1 + $0x1] ss:$9 sm:$0xff] %v501_v43 }
 0x261   : > { %648 = vst [vmem:[#allocation1 + $0x2] ss:$9 sm:$0xff] %v502_v44  ;;  %v693_v44 = vpop.permute.xlu2 %692 }
 0x262   : > { %649 = vst [vmem:[#allocation1 + $0x3] ss:$9 sm:$0xff] %v503_v46 }
 0x263   : > { %650 = vst [vmem:[#allocation1 + $0x4] ss:$9 sm:$0xff] %v504_v47  ;;  %v696_v47 = vpop.permute.xlu1 %695 }
 0x264   : > { %651 = vst [vmem:[#allocation1 + $0x5] ss:$9 sm:$0xff] %v505_v48 }
 0x265   : > { %652 = vst [vmem:[#allocation1 + $0x6] ss:$9 sm:$0xff] %v506_v49 }
 0x266   : > { %653 = vst [vmem:[#allocation1 + $0x7] ss:$9 sm:$0xff] %v507_v50  ;;  %v739_v50 = vlaneseq }
 0x268   : > { %v1584_v51 = vand.u32 127, %v739_v50 }
 0x269   : > { %v699_v45 = vpop.permute.xlu2 %698 }
 0x26a   : > { %v750_v61 = vadd.s32 4294967272, %v1584_v51  ;;  %v794_v50 = vadd.s32 4294967184, %v1584_v51  ;;  %vm970_vm1 = vcmp.lt.s32.totalorder %v1584_v51, 16 }
 0x26d   : > { %v654_v55 = vld [vmem:[#allocation1] sm:$0xff] }
 0x26e   : > { %655 = vst [vmem:[#allocation1] ss:$9 sm:$0xff] %v508_v52  ;;  %725 = vperm.xlu2 %1320, %v654_v55  }
 0x26f   : > { %656 = vst [vmem:[#allocation1 + $0x1] ss:$9 sm:$0xff] %v509_v53  ;;  %v742_v53 = vadd.s32 4294967288, %v1584_v51 }
 0x270   : > { %657 = vst [vmem:[#allocation1 + $0x2] ss:$9 sm:$0xff] %v510_v54 }
 0x271   : > { %658 = vst [vmem:[#allocation1 + $0x3] ss:$9 sm:$0xff] %v511_v56  ;;  %v702_v46 = vpop.permute.xlu2 %701  ;;  %v743_v55 = vperm.slane %v696_v47, %v742_v53  ;;  %v1440_v56 = vmov -inf   ;;  %v798_v53 = vadd.s32 4294967176, %v1584_v51 }
 0x272   : > { %659 = vst [vmem:[#allocation1 + $0x4] ss:$9 sm:$0xff] %v512_v57  ;;  %v746_v57 = vadd.s32 4294967280, %v1584_v51 }
 0x273   : > { %660 = vst [vmem:[#allocation1 + $0x5] ss:$9 sm:$0xff] %v513_v58  ;;  %v741_v58 = vperm.slane %v693_v44, %v1584_v51 }
 0x274   : > { %661 = vst [vmem:[#allocation1 + $0x6] ss:$9 sm:$0xff] %v514_v59  ;;  %v754_v59 = vadd.s32 4294967264, %v1584_v51 }
 0x275   : > { %662 = vst [vmem:[#allocation1 + $0x7] ss:$9 sm:$0xff] %v515_v60 }
 0x276   : > { %262 = vst [vmem:[#allocation2] sm:$0x1] %v1440_v56 }
 0x277   : > { %v705_v49 = vpop.permute.xlu1 %704 }
 0x279   : > { %v708_v48 = vpop.permute.xlu2 %707 }
 0x27c   : > { %v663_v1 = vld [vmem:[#allocation1] sm:$0xff] }
 0x27d   : > { %664 = vst [vmem:[#allocation1] ss:$9 sm:$0xff] %v516_v62  ;;  %728 = vperm.xlu1 %1321, %v663_v1   ;;  %v745_v62 = vsel %vm744_vm2, %v743_v55, %v741_v58 }
 0x27e   : > { %665 = vst [vmem:[#allocation1 + $0x1] ss:$9 sm:$0xff] %v517_v63 }
 0x27f   : > { %666 = vst [vmem:[#allocation1 + $0x2] ss:$9 sm:$0xff] %v518_v0  ;;  %v747_v0 = vperm.slane %v699_v45, %v746_v57 }
 0x280   : > { %667 = vst [vmem:[#allocation1 + $0x3] ss:$9 sm:$0xff] %v519_v2  ;;  %v755_v2 = vperm.slane %v705_v49, %v754_v59  ;;  %v790_v49 = vadd.s32 4294967192, %v1584_v51 }
 0x281   : > { %668 = vst [vmem:[#allocation1 + $0x4] ss:$9 sm:$0xff] %v520_v3  ;;  %v749_v1 = vsel %vm748_vm3, %v747_v0, %v745_v62  ;;  %v762_v3 = vadd.s32 4294967248, %v1584_v51 }
 0x282   : > { %669 = vst [vmem:[#allocation1 + $0x5] ss:$9 sm:$0xff] %v521_v4  ;;  %v751_v4 = vperm.slane %v702_v46, %v750_v61  ;;  %v1602_v61 = vld [vmem:[#allocation2] sm:$0x1] }
 0x283   : > { %670 = vst [vmem:[#allocation1 + $0x6] ss:$9 sm:$0xff] %v522_v5  ;;  %v758_v5 = vadd.s32 4294967256, %v1584_v51 }
 0x284   : > { %671 = vst [vmem:[#allocation1 + $0x7] ss:$9 sm:$0xff] %v523_v6  ;;  %v753_v6 = vsel %vm752_vm4, %v751_v4, %v749_v1 }
 0x285   : > { %v757_v7 = vsel %vm756_vm5, %v755_v2, %v753_v6 }
 0x28b   : > { %v672_v26 = vld [vmem:[#allocation1] sm:$0xff] }
 0x28c   : > { %731 = vperm.xlu2 %1320, %v672_v26   ;;  %673 = vst [vmem:[#allocation1] ss:$9 sm:$0xff] %v524_v8  ;;  %v714_v52 = vpop.permute.xlu2 %713  ;;  %v766_v26 = vadd.s32 4294967240, %v1584_v51 }
 0x28d   : > { %674 = vst [vmem:[#allocation1 + $0x1] ss:$9 sm:$0xff] %v525_v9  ;;  %v770_v9 = vadd.s32 4294967232, %v1584_v51 }
 0x28e   : > { %675 = vst [vmem:[#allocation1 + $0x2] ss:$9 sm:$0xff] %v526_v10 }
 0x28f   : > { %676 = vst [vmem:[#allocation1 + $0x3] ss:$9 sm:$0xff] %v527_v25  ;;  %v759_v25 = vperm.slane %v708_v48, %v758_v5 }
 0x290   : > { %677 = vst [vmem:[#allocation1 + $0x4] ss:$9 sm:$0xff] %v528_v27 }
 0x291   : > { %678 = vst [vmem:[#allocation1 + $0x5] ss:$9 sm:$0xff] %v529_v28  ;;  %v1441_v28 = vmov 0.0  }
 0x292   : > { %679 = vst [vmem:[#allocation1 + $0x6] ss:$9 sm:$0xff] %v530_v29  ;;  %v761_v29 = vsel %vm760_vm6, %v759_v25, %v757_v7 }
 0x293   : > { %680 = vst [vmem:[#allocation1 + $0x7] ss:$9 sm:$0xff] %v531_v31 }
 0x294   : > { %263 = vst [vmem:[#allocation3] sm:$0x1] %v1441_v28 }
 0x295   : > { %v711_v54 = vpop.permute.xlu1 %710 }
 0x296   : > { %v763_v8 = vperm.slane %v711_v54, %v762_v3 }
 0x298   : > { %v765_v31 = vsel %vm764_vm7, %v763_v8, %v761_v29 }
 0x29a   : > { %v681_v38 = vld [vmem:[#allocation1] sm:$0xff] }
 0x29b   : > { %734 = vperm.xlu1 %1321, %v681_v38   ;;  %682 = vst [vmem:[#allocation1] ss:$9 sm:$0xff] %v532_v33  ;;  %v778_v33 = vadd.s32 4294967216, %v1584_v51 }
 0x29c   : > { %683 = vst [vmem:[#allocation1 + $0x1] ss:$9 sm:$0xff] %v533_v34  ;;  %v767_v34 = vperm.slane %v714_v52, %v766_v26 }
 0x29d   : > { %684 = vst [vmem:[#allocation1 + $0x2] ss:$9 sm:$0xff] %v534_v36  ;;  %v774_v36 = vadd.s32 4294967224, %v1584_v51 }
 0x29e   : > { %685 = vst [vmem:[#allocation1 + $0x3] ss:$9 sm:$0xff] %v535_v37  ;;  %v769_v37 = vsel %vm768_vm8, %v767_v34, %v765_v31 }
 0x29f   : > { %686 = vst [vmem:[#allocation1 + $0x4] ss:$9 sm:$0xff] %v536_v39 }
 0x2a0   : > { %687 = vst [vmem:[#allocation1 + $0x5] ss:$9 sm:$0xff] %v537_v40 }
 0x2a1   : > { %688 = vst [vmem:[#allocation1 + $0x6] ss:$9 sm:$0xff] %v538_v41  ;;  %v786_v41 = vadd.s32 4294967200, %v1584_v51 }
 0x2a2   : > { %689 = vst [vmem:[#allocation1 + $0x7] ss:$9 sm:$0xff] %v539_v42 }
 0x2a9   : > { %v690_v43 = vld [vmem:[#allocation1] sm:$0xff] }
 0x2aa   : > { %737 = vperm.xlu2 %1320, %v690_v43   ;;  %v720_v60 = vpop.permute.xlu2 %719  ;;  %v782_v43 = vadd.s32 4294967208, %v1584_v51 }
 0x2ab   : > { %v775_v42 = vperm.slane %v720_v60, %v774_v36 }
 0x2b3   : > { %v717_v63 = vpop.permute.xlu1 %716 }
 0x2b4   : > { %v771_v32 = vperm.slane %v717_v63, %v770_v9 }
 0x2b6   : > { %v773_v38 = vsel %vm772_vm9, %v771_v32, %v769_v37 }
 0x2b7   : > { %v777_v45 = vsel %vm776_vm10, %v775_v42, %v773_v38 }
 0x2c8   : > { %v726_v10 = vpop.permute.xlu2 %725 }
 0x2c9   : > { %v783_v48 = vperm.slane %v726_v10, %v782_v43 }
 0x2d1   : > { %v723_v27 = vpop.permute.xlu1 %722 }
 0x2d2   : > { %v779_v39 = vperm.slane %v723_v27, %v778_v33 }
 0x2d4   : > { %v781_v46 = vsel %vm780_vm11, %v779_v39, %v777_v45 }
 0x2d5   : > { %v785_v52 = vsel %vm784_vm12, %v783_v48, %v781_v46 }
 0x2e6   : > { %v732_v40 = vpop.permute.xlu2 %731 }
 0x2e7   : > { %v791_v56 = vperm.slane %v732_v40, %v790_v49 }
 0x2ef   : > { %v729_v44 = vpop.permute.xlu1 %728 }
 0x2f0   : > { %v787_v47 = vperm.slane %v729_v44, %v786_v41 }
 0x2f2   : > { %v789_v54 = vsel %vm788_vm13, %v787_v47, %v785_v52 }
 0x2f3   : > { %v793_v60 = vsel %vm792_vm14, %v791_v56, %v789_v54 }
 0x304   : > { %v738_v55 = vpop.permute.xlu2 %737 }
 0x305   : > { %v799_v59 = vperm.slane %v738_v55, %v798_v53 }
 0x30d   : > { %v735_v57 = vpop.permute.xlu1 %734 }
 0x30e   : > { %v795_v58 = vperm.slane %v735_v57, %v794_v50 }
 0x310   : > { %v797_v62 = vsel %vm796_vm15, %v795_v58, %v793_v60 }
 0x311   : > { %v801_v63 = vsel %vm800_vm0, %v799_v59, %v797_v62 }
 0x312   : > { %v1605_v0 = vmax.f32 %v1602_v61, %v801_v63 }
 0x314   : > { %807 = vxpose.xlu1.b32.start.end [1/1] (short) %v1605_v0, 128  ;;  %v804_v1 = vsub.f32 %v1602_v61, %v1605_v0  ;;  %1084 = vst [vmem:[#allocation2] sm:$0x1] %v1605_v0 }
 0x316   : > { %v805_v51 = vmul.f32 1.442695, %v804_v1 }
 0x3b8   : > { %v823_v2 = vpop.trf.xlu1 }
 0x3c0   : > { %v824_v3 = vpop.trf.xlu1 }
 0x3c8   : > { %v825_v4 = vpop.trf.xlu1 }
 0x3d0   : > { %v826_v5 = vpop.trf.xlu1 }
 0x3d1   : > { %856 = vperm.xlu0 %1322, %v826_v5  }
 0x3d8   : > { %v827_v6 = vpop.trf.xlu1 }
 0x3e0   : > { %v828_v7 = vpop.trf.xlu1 }
 0x3e8   : > { %v829_v8 = vpop.trf.xlu1 }
 0x3f0   : > { %v830_v9 = vpop.trf.xlu1 }
 0x3f8   : > { %v831_v10 = vpop.trf.xlu1 }
 0x3f9   : > { %881 = vperm.xlu1 %1321, %v831_v10  }
 0x400   : > { %v832_v25 = vpop.trf.xlu1 }
 0x401   : > { %886 = vperm.xlu2 %1320, %v832_v25  }
 0x408   : > { %v833_v26 = vpop.trf.xlu1 }
 0x409   : > { %891 = vperm.xlu2 %1320, %v833_v26  }
 0x410   : > { %v834_v27 = vpop.trf.xlu1 }
 0x411   : > { %896 = vperm.xlu2 %1320, %v834_v27  }
 0x418   : > { %v835_v28 = vpop.trf.xlu1 }
 0x419   : > { %901 = vperm.xlu2 %1320, %v835_v28  }
 0x420   : > { %v836_v29 = vpop.trf.xlu1 }
 0x421   : > { %906 = vperm.xlu2 %1320, %v836_v29  }
 0x428   : > { %v837_v31 = vpop.trf.xlu1 }
 0x429   : > { %911 = vperm.xlu2 %1320, %v837_v31  }
 0x430   : > { %v838_v32 = vpop.trf.xlu1 }
 0x431   : > { %916 = vperm.xlu2 %1320, %v838_v32  }
 0x439   : > { %871 = vperm.xlu2 %1320, %v829_v8  }
 0x441   : > { %876 = vperm.xlu2 %1320, %v830_v9  }
 0x449   : > { %861 = vperm.xlu2 %1320, %v827_v6  }
 0x451   : > { %866 = vperm.xlu2 %1320, %v828_v7  }
 0x459   : > { %851 = vperm.xlu2 %1320, %v825_v4  }
 0x45b   : > { %v887_v33 = vpop.permute.xlu2 %886 }
 0x45c   : > { %v928_v60 = vsub.f32 %v1563_v20, %v887_v33 }
 0x45e   : > { %v953_v8 = vmul.f32 1.442695, %v928_v60 }
 0x461   : > { %841 = vperm.xlu2 %1320, %v823_v2  }
 0x463   : > { %v892_v34 = vpop.permute.xlu2 %891 }
 0x464   : > { %v929_v52 = vsub.f32 %v1566_v21, %v892_v34 }
 0x466   : > { %v955_v55 = vmul.f32 1.442695, %v929_v52 }
 0x469   : > { %846 = vperm.xlu2 %1320, %v824_v3  }
 0x46b   : > { %v897_v36 = vpop.permute.xlu2 %896  ;;  %v882_v54 = vpop.permute.xlu1 %881 }
 0x46c   : > { %v930_v50 = vsub.f32 %v1569_v22, %v897_v36  ;;  %v927_v21 = vsub.f32 %v1560_v19, %v882_v54 }
 0x46e   : > { %v951_v4 = vmul.f32 1.442695, %v927_v21 }
 0x473   : > { %v902_v37 = vpop.permute.xlu2 %901 }
 0x474   : > { %v931_v43 = vsub.f32 %v1572_v23, %v902_v37 }
 0x476   : > { %v959_v47 = vmul.f32 1.442695, %v931_v43 }
 0x47b   : > { %v907_v38 = vpop.permute.xlu2 %906 }
 0x47c   : > { %v932_v42 = vsub.f32 %v1575_v24, %v907_v38 }
 0x47e   : > { %v961_v44 = vmul.f32 1.442695, %v932_v42 }
 0x483   : > { %v912_v39 = vpop.permute.xlu2 %911 }
 0x484   : > { %v933_v40 = vsub.f32 %v1578_v30, %v912_v39  ;;  %v957_v30 = vmul.f32 1.442695, %v930_v50  ;;  %v857_v50 = vpop.permute.xlu0 %856 }
 0x486   : > { %v963_v41 = vmul.f32 1.442695, %v933_v40 }
 0x488   : > { %1323 = vpow2.f32 %v963_v41 }
 0x489   : > { %1325 = vpow2.f32 %v961_v44 }
 0x48b   : > { %v917_v45 = vpop.permute.xlu2 %916 }
 0x48c   : > { %v934_v46 = vsub.f32 %v1581_v35, %v917_v45 }
 0x48e   : > { %v965_v48 = vmul.f32 1.442695, %v934_v46  ;;  %v1324_v49 = vpop.eup %1323 }
 0x48f   : > { %v987_v23 = vsel %vm970_vm1, %v1324_v49, 0.0  ;;  %v1326_v53 = vpop.eup %1325 }
 0x490   : > { %1327 = vpow2.f32 %v965_v48  ;;  %v1003_v56 = vpack.c.bf16 %v987_v23, %v987_v23  ;;  %v986_v59 = vsel %vm970_vm1, %v1326_v53, 0.0  ;;  %v922_v23 = vsub.f32 %v1545_v14, %v857_v50 }
 0x491   : > { %1329 = vpow2.f32 %v959_v47  ;;  %v1002_v6 = vpack.c.bf16 %v986_v59, %v986_v59 }
 0x492   : > { %1331 = vpow2.f32 %v957_v30  ;;  %v1041_v62 = vunpack.c.l.b16 %v1003_v56 }
 0x493   : > { %v872_v24 = vpop.permute.xlu2 %871  ;;  %1333 = vpow2.f32 %v955_v55  ;;  %v1040_v25 = vunpack.c.l.b16 %v1002_v6 }
 0x494   : > { %1335 = vpow2.f32 %v951_v4  ;;  %v925_v26 = vsub.f32 %v1554_v17, %v872_v24 }
 0x495   : > { %1337 = vpow2.f32 %v953_v8 }
 0x496   : > { %v1328_v35 = vpop.eup %1327  ;;  %v947_v36 = vmul.f32 1.442695, %v925_v26 }
 0x497   : > { %v988_v57 = vsel %vm970_vm1, %v1328_v35, 0.0  ;;  %v1330_v22 = vpop.eup %1329 }
 0x498   : > { %v1004_v58 = vpack.c.bf16 %v988_v57, %v988_v57  ;;  %v985_v3 = vsel %vm970_vm1, %v1330_v22, 0.0  ;;  %v1332_v7 = vpop.eup %1331  ;;  %v941_v57 = vmul.f32 1.442695, %v922_v23 }
 0x499   : > { %v1001_v19 = vpack.c.bf16 %v985_v3, %v985_v3  ;;  %v1334_v9 = vpop.eup %1333  ;;  %v984_v20 = vsel %vm970_vm1, %v1332_v7, 0.0 }
 0x49a   : > { %v1042_v63 = vunpack.c.l.b16 %v1004_v58  ;;  %v983_v29 = vsel %vm970_vm1, %v1334_v9, 0.0  ;;  %v1000_v33 = vpack.c.bf16 %v984_v20, %v984_v20  ;;  %v1336_v34 = vpop.eup %1335 }
 0x49b   : > { %v877_v2 = vpop.permute.xlu2 %876  ;;  %v1039_v27 = vunpack.c.l.b16 %v1001_v19  ;;  %v999_v37 = vpack.c.bf16 %v983_v29, %v983_v29  ;;  %v981_v39 = vsel %vm970_vm1, %v1336_v34, 0.0 }
 0x49c   : > { %v1050_v5 = vpack.c.b16 %v1042_v63, %v1041_v62  ;;  %v926_v10 = vsub.f32 %v1557_v18, %v877_v2  ;;  %v1338_v18 = vpop.eup %1337  ;;  %v1038_v38 = vunpack.c.l.b16 %v1000_v33  ;;  %v997_v45 = vpack.c.bf16 %v981_v39, %v981_v39 }
 0x49d   : > { %v1049_v32 = vpack.c.b16 %v1040_v25, %v1039_v27  ;;  %v1037_v40 = vunpack.c.l.b16 %v999_v37  ;;  %v982_v42 = vsel %vm970_vm1, %v1338_v18, 0.0 }
 0x49e   : > { %1059 = vmatpush.bf16.xpose.msra.mxu1 %v1050_v5  ;;  %v949_v31 = vmul.f32 1.442695, %v926_v10  ;;  %v998_v49 = vpack.c.bf16 %v982_v42, %v982_v42  ;;  %v1035_v24 = vunpack.c.l.b16 %v997_v45  ;;  %v1080_v45 = vld [vmem:[#allocation3] sm:$0x1] }
 0x49f   : > { %v1048_v44 = vpack.c.b16 %v1038_v38, %v1037_v40  ;;  %v1253_v40 = vld [vmem:[%s256_s10] sm:$0xf] }
 0x4a0   : > { %1339 = vpow2.f32 %v949_v31  ;;  %v1036_v30 = vunpack.c.l.b16 %v998_v49 }
 0x4a1   : > { %1341 = vpow2.f32 %v947_v36 }
 0x4a2   : > { %v1047_v35 = vpack.c.b16 %v1036_v30, %v1035_v24 }
 0x4a3   : > { %v862_v28 = vpop.permute.xlu2 %861 }
 0x4a4   : > { %v923_v17 = vsub.f32 %v1548_v15, %v862_v28 }
 0x4a6   : > { %1060 = vmatpush.bf16.xpose.msra.mxu1 %v1049_v32  ;;  %v1340_v46 = vpop.eup %1339  ;;  %v943_v47 = vmul.f32 1.442695, %v923_v17 }
 0x4a7   : > { %v1342_v52 = vpop.eup %1341  ;;  %v980_v15 = vsel %vm970_vm1, %v1340_v46, 0.0 }
 0x4a8   : > { %v996_v55 = vpack.c.bf16 %v980_v15, %v980_v15 }
 0x4aa   : > { %v1034_v59 = vunpack.c.l.b16 %v996_v55 }
 0x4ab   : > { %v867_v41 = vpop.permute.xlu2 %866 }
 0x4ac   : > { %v924_v43 = vsub.f32 %v1551_v16, %v867_v41  ;;  %v979_v16 = vsel %vm970_vm1, %v1342_v52, 0.0  ;;  %v1260_v41 = vld [vmem:[%s256_s10] sm:$0x10] }
 0x4ad   : > { %v995_v21 = vpack.c.bf16 %v979_v16, %v979_v16  ;;  %v1254_v42 = vor.u32 %v1260_v41, %v1253_v40 }
 0x4ae   : > { %v945_v48 = vmul.f32 1.442695, %v924_v43  ;;  %1061 = vmatpush.bf16.xpose.msra.mxu1 %v1048_v44 }
 0x4af   : > { %v1033_v60 = vunpack.c.l.b16 %v995_v21 }
 0x4b0   : > { %1343 = vpow2.f32 %v945_v48 }
 0x4b1   : > { %1345 = vpow2.f32 %v943_v47  ;;  %v1046_v2 = vpack.c.b16 %v1034_v59, %v1033_v60 }
 0x4b3   : > { %v852_v53 = vpop.permute.xlu2 %851 }
 0x4b4   : > { %v921_v54 = vsub.f32 %v1542_v13, %v852_v53 }
 0x4b6   : > { %v1344_v56 = vpop.eup %1343  ;;  %v939_v22 = vmul.f32 1.442695, %v921_v54  ;;  %1062 = vmatpush.bf16.xpose.msra.mxu1 %v1047_v35 }
 0x4b7   : > { %v1346_v58 = vpop.eup %1345  ;;  %v978_v14 = vsel %vm970_vm1, %v1344_v56, 0.0 }
 0x4b8   : > { %1347 = vpow2.f32 %v939_v22  ;;  %v977_v63 = vsel %vm970_vm1, %v1346_v58, 0.0  ;;  %v994_v3 = vpack.c.bf16 %v978_v14, %v978_v14 }
 0x4b9   : > { %1349 = vpow2.f32 %v941_v57  ;;  %v993_v6 = vpack.c.bf16 %v977_v63, %v977_v63 }
 0x4ba   : > { %v1032_v8 = vunpack.c.l.b16 %v994_v3 }
 0x4bb   : > { %v842_v62 = vpop.permute.xlu2 %841  ;;  %v1031_v9 = vunpack.c.l.b16 %v993_v6 }
 0x4bc   : > { %v919_v13 = vsub.f32 %v1536_v11, %v842_v62 }
 0x4bd   : > { %v1045_v11 = vpack.c.b16 %v1032_v8, %v1031_v9 }
 0x4be   : > { %v1348_v4 = vpop.eup %1347  ;;  %v935_v5 = vmul.f32 1.442695, %v919_v13  ;;  %1063 = vmatpush.bf16.xpose.msra.mxu1 %v1046_v2 }
 0x4bf   : > { %v1350_v7 = vpop.eup %1349  ;;  %v975_v19 = vsel %vm970_vm1, %v1348_v4, 0.0 }
 0x4c0   : > { %1351 = vpow2.f32 %v935_v5  ;;  %v976_v25 = vsel %vm970_vm1, %v1350_v7, 0.0  ;;  %v991_v26 = vpack.c.bf16 %v975_v19, %v975_v19 }
 0x4c1   : > { %v992_v28 = vpack.c.bf16 %v976_v25, %v976_v25 }
 0x4c2   : > { %v1029_v31 = vunpack.c.l.b16 %v991_v26 }
 0x4c3   : > { %v847_v10 = vpop.permute.xlu2 %846  ;;  %v1030_v32 = vunpack.c.l.b16 %v992_v28 }
 0x4c4   : > { %v920_v20 = vsub.f32 %v1539_v12, %v847_v10 }
 0x4c5   : > { %v1044_v34 = vpack.c.b16 %v1030_v32, %v1029_v31 }
 0x4c6   : > { %v937_v27 = vmul.f32 1.442695, %v920_v20  ;;  %1064 = vmatpush.bf16.xpose.msra.mxu1 %v1045_v11  ;;  %v1352_v29 = vpop.eup %1351 }
 0x4c7   : > { %v973_v33 = vsel %vm970_vm1, %v1352_v29, 0.0 }
 0x4c8   : > { %1353 = vpow2.f32 %v937_v27  ;;  %v989_v37 = vpack.c.bf16 %v973_v33, %v973_v33 }
 0x4c9   : > { %1355 = vpow2.f32 %v805_v51 }
 0x4ca   : > { %v1027_v38 = vunpack.c.l.b16 %v989_v37 }
 0x4ce   : > { %v1354_v36 = vpop.eup %1353  ;;  %1065 = vmatpush.bf16.xpose.msra.mxu1 %v1044_v34 }
 0x4cf   : > { %v974_v12 = vsel %vm970_vm1, %v1354_v36, 0.0  ;;  %v1356_v44 = vpop.eup %1355 }
 0x4d0   : > { %v990_v18 = vpack.c.bf16 %v974_v12, %v974_v12  ;;  %v1081_v46 = vmul.f32 %v1356_v44, %v1080_v45  ;;  %v1075_v61 = vperm.slane %v1356_v44, 0 }
 0x4d2   : > { %v1028_v39 = vunpack.c.l.b16 %v990_v18  ;;  %v1077_v53 = vmul.f32 0.0, %v1075_v61 }
 0x4d4   : > { %v1043_v17 = vpack.c.b16 %v1028_v39, %v1027_v38 }
 0x4d6   : > { %1066 = vmatpush.bf16.xpose.msra.mxu1 %v1043_v17 }
 0x4dd   : > { %1067 = vmatmul.bf16.vlgmr.msra.gmra.mxu1 %v1254_v42 }
 0x55a   : > { %v1068_v43 = vpop.f32.mrf.mxu1 }
 0x55b   : > { %v1078_v35 = vadd.f32 %v1077_v53, %v1068_v43 }
 0x562   : > { %v1070_v47 = vpop.f32.mrf.mxu1 }
 0x563   : > { %v1082_v48 = vadd.f32 %v1081_v46, %v1070_v47 }
 0x565   : > { %1083 = vst [vmem:[#allocation3] sm:$0x1] %v1082_v48 }
 0x56c   : > { %v1088_v49 = vld [vmem:[#allocation3] sm:$0x1] }
 0x56d   : > { %1357 = vrcp.f32 %v1088_v49  ;;  %v1100_v15 = vand.u32 2147483648, %v1088_v49  ;;  %v1098_v1 = vand.u32 2147483647, %v1088_v49  ;;  %vm1094_vm3 = vweird.f32 %v1088_v49 }
 0x56f   : > { %v1101_v30 = vor.u32 1.1754944e-38, %v1100_v15  ;;  %vm1099_vm5 = vcmp.eq.f32.partialorder %v1098_v1, 8.507059e+37 }
 0x573   : > { %v1358_v50 = vpop.eup %1357 }
 0x574   : > { %v1090_v52 = vmul.f32 %v1358_v50, %v1088_v49  ;;  %vm1095_vm2 = vweird.f32 %v1358_v50 }
 0x575   : > { %vm1096_vm4 = vmor %vm1094_vm3, %vm1095_vm2 }
 0x576   : > { %v1091_v24 = vsub.f32 1.0, %v1090_v52 }
 0x578   : > { %v1092_v0 = vmul.f32 %v1358_v50, %v1091_v24 }
 0x57a   : > { %v1093_v23 = vadd.f32 %v1358_v50, %v1092_v0 }
 0x57c   : > { %v1097_v16 = vsel %vm1096_vm4, %v1358_v50, %v1093_v23 }
 0x57d   : > { %v1102_v54 = vsel %vm1099_vm5, %v1101_v30, %v1097_v16 }
 0x57e   : > { %v1105_v55 = vperm.slane %v1102_v54, 0 }
 0x580   : > { %v1107_v56 = vmul.f32 %v1105_v55, %v1078_v35 }
 0x582   : > { %1108 = vst [vmem:[%s234_s27] sm:$0xff] %v1107_v56 }
 0x583   : > { %1386 = shalt.err (!%p1383_p5)
}
 0x584   : > { %1262 = dma.vmem_to_hbm [thread:$0]  (%p1502_p4), %s1124_s28, 128, %s1126_s15, %s1110_s29  }
 0x585 PF: > { %p1268_p6 = scmp.ge.s32.totalorder %s1437_s17, 2  ;;  %s1137_s10 = sand.u32 1, %s1417_s12  }
 0x586   : > { %s1138_s11 = scalar_lea.sflag [#allocation6], %s1137_s10 }
 0x587   : > { %p1265_p7 = pnand %p1268_p6, %p1509_p8 }
 0x589   : > { %p1266_p9 = pneg %p1265_p7 }
 0x58b   : > { %1412 = dma.done.wait (%p1266_p9), %s1138_s11, 128  }
 0x58c   : > { %1414 = vsyncadd (%p1266_p9), %s1138_s11, 4294967168  ;;  %s16_s17 = sadd.s32 1, %s1437_s17   ;;  %s1710_s12 = smov %s1421_s13 }
 0x58d   : > { %p13_p10 = scmp.ge.s32.totalorder %s16_s17, 6   ;;  %s1711_s13 = smov %s1425_s14 }
 0x58e   : > { %s1712_s14 = smov %s1515_s25  ;;  %s1713_s15 = smov %s1433_s16 }
 0x58f   : > { %s1714_s16 = smov %s1716_s20  ;;  %15 = sbr.rel (!%p13_p10) target bundleno = 4 (0x4), region = 88 }
 0x594   :  { %1144 = vsyncpa [#allocation6], 1 }
 0x595   :  { %1146 = vsyncpa [#allocation6 + $0x1], 1 }

</bundles_post_ra>
